<compile_context>
chip_gen: v6e
topology: v6e:2x2x1
jax: 0.10.0
libtpu: 0.0.40
codegen_flags: <defaults>
</compile_context>

<pallas_src>
import functools

import jax
import jax.numpy as jnp
from jax import lax
from jax.experimental import pallas as pl
from jax.experimental.pallas import tpu as pltpu


def _energy_loss_kernel(out_ref, tgt_ref, psum_ref, acc_ref, *, n_rows):
    """Accumulate sum_i log(x[i, t_i] / (sum_j x[i, j] + 1e-6) + 1e-6) per core.

    out_ref : (BLOCK_N, C)  model outputs tile (native dtype, cast in-vreg)
    tgt_ref : (BLOCK_N, 1)  int32 class indices tile
    psum_ref: (8, 128) f32  per-partial output block (partial sum lives at [0,0])
    acc_ref : (1, 1)   f32  running accumulator (VMEM scratch)
    """
    c = pl.program_id(0)           # partial-sum / core axis ("parallel")
    i = pl.program_id(1)           # row-tile axis ("arbitrary" reduction)

    @pl.when(i == 0)
    def _init():
        acc_ref[...] = jnp.zeros_like(acc_ref)

    x = out_ref[...].astype(jnp.float32)                 # cast in-vreg (VPU slack)
    bn, n_cls = x.shape
    tgt = tgt_ref[...]                                   # (bn, 1) int32

    # Row sum (denominator) and one-hot gather of the target column: pure
    # VPU/XLU streaming work over the (bn, C) tile.
    denom = jnp.sum(x, axis=1, keepdims=True) + 1e-6                      # (bn, 1)
    col = lax.broadcasted_iota(jnp.int32, (bn, n_cls), 1)
    # NOTE: out-of-range targets silently contribute 0 (PyTorch NLLLoss raises).
    x_t = jnp.sum(jnp.where(col == tgt, x, 0.0), axis=1, keepdims=True)   # (bn, 1)

    # Only bn divides + bn logs hit the single EUP slot (instead of bn * C).
    logp_t = jnp.log(x_t / denom + 1e-6)                                  # (bn, 1)

    # Mask rows beyond N: covers the partial last tile and any duplicated
    # (index-clamped) tile assigned to the second partial.
    row = lax.broadcasted_iota(jnp.int32, (bn, 1), 0)
    tile_id = c * pl.num_programs(1) + i
    global_row = tile_id * bn + row
    valid = global_row < n_rows
    acc_ref[...] += jnp.sum(jnp.where(valid, logp_t, 0.0), axis=0, keepdims=True)

    @pl.when(i == pl.num_programs(1) - 1)
    def _finalize():
        r8 = lax.broadcasted_iota(jnp.int32, (8, 128), 0)
        c128 = lax.broadcasted_iota(jnp.int32, (8, 128), 1)
        psum_ref[...] = jnp.where((r8 == 0) & (c128 == 0), acc_ref[...], 0.0)


def _choose_block_n(n_rows, n_cls, itemsize):
    # ~2 MiB per input buffer -> ~4-5 MiB in flight when double-buffered:
    # comfortably inside the scoped-VMEM default on v5e/v6e/v7x.
    target_bytes = 2 * 1024 * 1024
    bn = max(8, target_bytes // max(1, n_cls * itemsize))
    if bn >= n_rows:
        return n_rows
    return max(32, (bn // 32) * 32)   # sublane-aligned for f32 / bf16 / int8


def energy_maximization_loss(outputs, targets, *, block_n=None):
    """outputs: (N, C) scores, targets: (N,) int class indices -> scalar loss."""
    n_rows, n_cls = outputs.shape
    tgt2d = targets.astype(jnp.int32).reshape(n_rows, 1)

    if block_n is None:
        block_n = _choose_block_n(n_rows, n_cls, outputs.dtype.itemsize)
    block_n = min(block_n, n_rows)

    num_tiles = pl.cdiv(n_rows, block_n)
    n_partials = 2 if num_tiles >= 2 else 1       # one partial per TC on v7x
    tiles_per_partial = pl.cdiv(num_tiles, n_partials)

    def in_map(c, i):
        # Clamp so a DMA never starts past the array; the duplicated tile this
        # can create is masked out inside the kernel by the global-row check.
        return (jnp.minimum(c * tiles_per_partial + i, num_tiles - 1), 0)

    kernel = functools.partial(_energy_loss_kernel, n_rows=n_rows)

    partials = pl.pallas_call(
        kernel,
        out_shape=jax.ShapeDtypeStruct((n_partials * 8, 128), jnp.float32),
        grid_spec=pltpu.PrefetchScalarGridSpec(
            num_scalar_prefetch=0,
            grid=(n_partials, tiles_per_partial),
            in_specs=[
                pl.BlockSpec((block_n, n_cls), in_map),
                pl.BlockSpec((block_n, 1), in_map),
            ],
            out_specs=pl.BlockSpec((8, 128), lambda c, i: (c, 0)),
            scratch_shapes=[pltpu.VMEM((1, 1), jnp.float32)],
        ),
        compiler_params=pltpu.CompilerParams(
            dimension_semantics=("parallel", "arbitrary")),
    )(outputs, tgt2d)

    # Each partial-sum block is zero except at [0, 0]; sum + mean + negate.
    return -jnp.sum(partials) / jnp.float32(n_rows)


if __name__ == "__main__":
    key = jax.random.PRNGKey(0)
    k1, k2, k3, k4 = jax.random.split(key, 4)

    def reference(outputs, targets):
        probs = outputs / (jnp.sum(outputs, axis=1, keepdims=True) + 1e-6)
        logp = jnp.log(probs + 1e-6)
        return -jnp.mean(logp[jnp.arange(outputs.shape[0]), targets])

    # Small case (single tile, single partial).
    n, c = 8, 32
    outputs = jax.random.uniform(k1, (n, c), jnp.float32, minval=0.05, maxval=1.0)
    targets = jax.random.randint(k2, (n,), 0, c, dtype=jnp.int32)
    loss = jax.jit(energy_maximization_loss)(outputs, targets)
    loss = jax.block_until_ready(loss)
    ref = reference(outputs, targets)
    assert jnp.allclose(loss, ref, rtol=1e-5, atol=1e-5), (loss, ref)

    # Multi-tile case: exercises row streaming, a partial last tile
    # (200 % 64 != 0), and the two-way partial-sum split.
    n2, c2 = 200, 128
    outputs2 = jax.random.uniform(k3, (n2, c2), jnp.float32, minval=0.05,
                                  maxval=1.0)
    targets2 = jax.random.randint(k4, (n2,), 0, c2, dtype=jnp.int32)
    fn2 = jax.jit(functools.partial(energy_maximization_loss, block_n=64))
    loss2 = jax.block_until_ready(fn2(outputs2, targets2))
    ref2 = reference(outputs2, targets2)
    assert jnp.allclose(loss2, ref2, rtol=1e-5, atol=1e-5), (loss2, ref2)

    print("KERNEL_OK")
</pallas_src>

<mosaic_0001>
module attributes {stable_mosaic.version = 11 : i64} {
  func.func @_energy_loss_kernel(%arg0: i32, %arg1: i32, %arg2: memref<8x32xf32, #tpu.memory_space<vmem>>, %arg3: memref<8x1xi32, #tpu.memory_space<vmem>>, %arg4: memref<8x128xf32, #tpu.memory_space<vmem>>, %arg5: memref<1x1xf32, #tpu.memory_space<vmem>>) attributes {dimension_semantics = [#tpu.dimension_semantics<parallel>, #tpu.dimension_semantics<arbitrary>], iteration_bounds = array<i64: 1, 1>, scalar_prefetch = 0 : i64, scratch_operands = 1 : i64, tpu.core_type = #tpu.core_type<tc>, window_params = [{transform_indices = @transform_0, window_bounds = array<i64: 8, 32>}, {transform_indices = @transform_1, window_bounds = array<i64: 8, 1>}, {transform_indices = @transform_2, window_bounds = array<i64: 8, 128>}]} {
    %c0_i32 = arith.constant 0 : i32
    %0 = arith.cmpi eq, %arg1, %c0_i32 : i32
    %1 = arith.extui %0 : i1 to i32
    %c0_i32_0 = arith.constant 0 : i32
    %2 = arith.cmpi ne, %1, %c0_i32_0 : i32
    scf.if %2 {
      %cst_17 = arith.constant 0.000000e+00 : f32
      %38 = vector.broadcast %cst_17 : f32 to vector<1x1xf32>
      %c0_18 = arith.constant 0 : index
      %c0_19 = arith.constant 0 : index
      %39 = vector.load %arg5[%c0_18, %c0_19] : memref<1x1xf32, #tpu.memory_space<vmem>>, vector<1x1xf32>
      tpu.vector_store %arg5[%c0_18, %c0_19], %38 {strides = array<i32>} : memref<1x1xf32, #tpu.memory_space<vmem>>, vector<1x1xf32>,
    } else {
    }
    %c0 = arith.constant 0 : index
    %c0_1 = arith.constant 0 : index
    %3 = vector.load %arg2[%c0, %c0_1] : memref<8x32xf32, #tpu.memory_space<vmem>>, vector<8x32xf32>
    %c0_2 = arith.constant 0 : index
    %c0_3 = arith.constant 0 : index
    %4 = vector.load %arg3[%c0_2, %c0_3] : memref<8x1xi32, #tpu.memory_space<vmem>>, vector<8x1xi32>
    %cst = arith.constant dense<0.000000e+00> : vector<8xf32>
    %5 = vector.multi_reduction <add>, %3, %cst [1] : vector<8x32xf32> to vector<8xf32>
    %6 = vector.shape_cast %5 : vector<8xf32> to vector<8x1xf32>
    %cst_4 = arith.constant 9.99999997E-7 : f32
    %7 = vector.broadcast %cst_4 : f32 to vector<8x1xf32>
    %8 = arith.addf %6, %7 : vector<8x1xf32>
    %9 = tpu.iota {dimensions = array<i32: 1>} : vector<8x32xi32>
    %10 = vector.broadcast %4 : vector<8x1xi32> to vector<8x32xi32>
    %11 = arith.cmpi eq, %9, %10 : vector<8x32xi32>
    %cst_5 = arith.constant 0.000000e+00 : f32
    %12 = vector.broadcast %cst_5 : f32 to vector<8x32xf32>
    %13 = arith.select %11, %3, %12 : vector<8x32xi1>, vector<8x32xf32>
    %cst_6 = arith.constant dense<0.000000e+00> : vector<8xf32>
    %14 = vector.multi_reduction <add>, %13, %cst_6 [1] : vector<8x32xf32> to vector<8xf32>
    %15 = vector.shape_cast %14 : vector<8xf32> to vector<8x1xf32>
    %16 = arith.divf %15, %8 : vector<8x1xf32>
    %cst_7 = arith.constant 9.99999997E-7 : f32
    %17 = vector.broadcast %cst_7 : f32 to vector<8x1xf32>
    %18 = arith.addf %16, %17 : vector<8x1xf32>
    %19 = math.log %18 : vector<8x1xf32>
    %20 = tpu.iota {dimensions = array<i32: 0>} : vector<8x1xi32>
    %c1_i32 = arith.constant 1 : i32
    %21 = arith.muli %arg0, %c1_i32 : i32
    %22 = arith.addi %21, %arg1 : i32
    %c8_i32 = arith.constant 8 : i32
    %23 = arith.muli %22, %c8_i32 : i32
    %24 = vector.broadcast %23 : i32 to vector<8x1xi32>
    %25 = arith.addi %24, %20 : vector<8x1xi32>
    %c8_i32_8 = arith.constant 8 : i32
    %26 = vector.broadcast %c8_i32_8 : i32 to vector<8x1xi32>
    %27 = arith.cmpi slt, %25, %26 : vector<8x1xi32>
    %c0_9 = arith.constant 0 : index
    %c0_10 = arith.constant 0 : index
    %28 = vector.load %arg5[%c0_9, %c0_10] : memref<1x1xf32, #tpu.memory_space<vmem>>, vector<1x1xf32>
    %cst_11 = arith.constant 0.000000e+00 : f32
    %29 = vector.broadcast %cst_11 : f32 to vector<8x1xf32>
    %30 = arith.select %27, %19, %29 : vector<8x1xi1>, vector<8x1xf32>
    %cst_12 = arith.constant dense<0.000000e+00> : vector<1xf32>
    %31 = vector.multi_reduction <add>, %30, %cst_12 [0] : vector<8x1xf32> to vector<1xf32>
    %32 = vector.shape_cast %31 : vector<1xf32> to vector<1x1xf32>
    %33 = arith.addf %28, %32 : vector<1x1xf32>
    %c0_13 = arith.constant 0 : index
    %c0_14 = arith.constant 0 : index
    %34 = vector.load %arg5[%c0_13, %c0_14] : memref<1x1xf32, #tpu.memory_space<vmem>>, vector<1x1xf32>
    tpu.vector_store %arg5[%c0_13, %c0_14], %33 {strides = array<i32>} : memref<1x1xf32, #tpu.memory_space<vmem>>, vector<1x1xf32>,
    %c0_i32_15 = arith.constant 0 : i32
    %35 = arith.cmpi eq, %arg1, %c0_i32_15 : i32
    %36 = arith.extui %35 : i1 to i32
    %c0_i32_16 = arith.constant 0 : i32
    %37 = arith.cmpi ne, %36, %c0_i32_16 : i32
    scf.if %37 {
      %38 = tpu.iota {dimensions = array<i32: 0>} : vector<8x128xi32>
      %39 = tpu.iota {dimensions = array<i32: 1>} : vector<8x128xi32>
      %c0_i32_17 = arith.constant 0 : i32
      %40 = vector.broadcast %c0_i32_17 : i32 to vector<8x128xi32>
      %41 = arith.cmpi eq, %38, %40 : vector<8x128xi32>
      %c0_i32_18 = arith.constant 0 : i32
      %42 = vector.broadcast %c0_i32_18 : i32 to vector<8x128xi32>
      %43 = arith.cmpi eq, %39, %42 : vector<8x128xi32>
      %44 = arith.andi %41, %43 : vector<8x128xi1>
      %c0_19 = arith.constant 0 : index
      %c0_20 = arith.constant 0 : index
      %45 = vector.load %arg5[%c0_19, %c0_20] : memref<1x1xf32, #tpu.memory_space<vmem>>, vector<1x1xf32>
      %cst_21 = arith.constant 0.000000e+00 : f32
      %46 = vector.shape_cast %45 : vector<1x1xf32> to vector<1x1xf32>
      %47 = vector.broadcast %46 : vector<1x1xf32> to vector<8x128xf32>
      %48 = vector.broadcast %cst_21 : f32 to vector<8x128xf32>
      %49 = arith.select %44, %47, %48 : vector<8x128xi1>, vector<8x128xf32>
      %c0_22 = arith.constant 0 : index
      %c0_23 = arith.constant 0 : index
      %50 = vector.load %arg4[%c0_22, %c0_23] : memref<8x128xf32, #tpu.memory_space<vmem>>, vector<8x128xf32>
      tpu.vector_store %arg4[%c0_22, %c0_23], %49 {strides = array<i32>} : memref<8x128xf32, #tpu.memory_space<vmem>>, vector<8x128xf32>,
    } else {
    }
    return
  }
  func.func @transform_0(%arg0: i32, %arg1: i32) -> (i32, i32) {
    %c1_i32 = arith.constant 1 : i32
    %0 = arith.muli %arg0, %c1_i32 : i32
    %1 = arith.addi %0, %arg1 : i32
    %c0_i32 = arith.constant 0 : i32
    %2 = arith.minsi %1, %c0_i32 : i32
    %c0_i32_0 = arith.constant 0 : i32
    %c0_i32_1 = arith.constant 0 : i32
    return %2, %c0_i32_0 : i32, i32
  }
  func.func @transform_1(%arg0: i32, %arg1: i32) -> (i32, i32) {
    %c1_i32 = arith.constant 1 : i32
    %0 = arith.muli %arg0, %c1_i32 : i32
    %1 = arith.addi %0, %arg1 : i32
    %c0_i32 = arith.constant 0 : i32
    %2 = arith.minsi %1, %c0_i32 : i32
    %c0_i32_0 = arith.constant 0 : i32
    %c0_i32_1 = arith.constant 0 : i32
    return %2, %c0_i32_0 : i32, i32
  }
  func.func @transform_2(%arg0: i32, %arg1: i32) -> (i32, i32) {
    %c0_i32 = arith.constant 0 : i32
    %c0_i32_0 = arith.constant 0 : i32
    return %arg0, %c0_i32 : i32, i32
  }
}

</mosaic_0001>

<bundles_post_ra>
// kernel: energy_maximization_loss.1
= control target key start
LH: loop header
LB: loop body
LE: loop exit
PB: predicated region body
PF: predicated region fallthrough
CT: control target
= control target key end

     0   :  { %v154_v0 = vmov 0   ;;  %vm73_vm0 = vcmask 261120   ;;  %vm69_vm1 = vcmask 0   ;;  %v155_v4 = vmov 0.0   ;;  %s182_s1 = inlined_call_operand.vmem [shape: s32[8,1], index: 1, kind: input, shape index: {}]   ;;  %s183_s0 = inlined_call_operand.vmem [shape: f32[8,32], index: 0, kind: input, shape index: {}]   ;;  %s184_s2 = inlined_call_operand.vmem [shape: f32[8,128], index: 2, kind: output, shape index: {}]  }
   0x1   :  { %148 = vset.pattern.permute.xlu0 %v154_v0  ;;  %v72_v1 = vld [vmem:[%s182_s1] sm:$0xff]  ;;  %149 = vset.pattern.permute.xlu1 %v154_v0  ;;  %70 = vst.msk [vmem:[#allocation2] sm:$0x1] %vm69_vm1, %v155_v4  ;;  %v78_v5 = vlaneseq }
   0x2   :  { %81 = vperm.xlu0 %148, %v72_v1   ;;  %v71_v2 = vld [vmem:[%s183_s0] sm:$0xff] }
   0x3   :  { %v74_v3 = vsel %vm73_vm0, %v71_v2, 0.0  ;;  %v79_v6 = vand.u32 127, %v78_v5  ;;  %v94_v27 = vshrl.u32 %v78_v5, 7 }
   0x5   :  { %vm114_vm3 = vcmp.eq.s32.totalorder %v94_v27, 0  ;;  %vm115_vm4 = vcmp.eq.s32.totalorder %v79_v6, 0 }
   0x6   :  { %vm116_vm5 = vmand %vm114_vm3, %vm115_vm4 }
   0x8   :  { %v100_v23 = vld [vmem:[#allocation2] sm:$0x1] }
  0x21   :  { %75 = vadd.xlane.f32.xlu0 %v74_v3 }
  0x7d   :  { %v82_v7 = vpop.permute.xlu0 %81 }
  0x7e   :  { %vm83_vm2 = vcmp.eq.s32.totalorder %v79_v6, %v82_v7 }
  0x7f   :  { %v84_v8 = vsel %vm83_vm2, %v71_v2, 0.0 }
  0x80   :  { %v85_v9 = vsel %vm73_vm0, %v84_v8, 0.0 }
  0x81   :  { %86 = vadd.xlane.f32.xlu1 %v85_v9 }
  0xaa   :  { %v76_v10 = vpop.xlane.xlu0 %75 }
  0xab   :  { %v77_v11 = vadd.f32 1e-06, %v76_v10 }
  0xad   :  { %150 = vrcp.f32 %v77_v11 }
  0xba   :  { %v151_v12 = vpop.eup %150 }
 0x10a   :  { %v87_v13 = vpop.xlane.xlu1 %86 }
 0x10b   :  { %v89_v14 = vmul.f32 %v151_v12, %v87_v13 }
 0x10d   :  { %v90_v15 = vadd.f32 1e-06, %v89_v14 }
 0x10f   :  { %152 = vlog2.f32 %v90_v15 }
 0x11c   :  { %v153_v16 = vpop.eup %152 }
 0x11d   :  { %v92_v17 = vmul.f32 0.6931472, %v153_v16 }
 0x11f   :  { %v102_v18 = vrot.slane %v92_v17, 4 }
 0x121   :  { %v103_v19 = vadd.f32 %v102_v18, %v92_v17 }
 0x123   :  { %v104_v20 = vrot.slane %v103_v19, 2 }
 0x125   :  { %v105_v21 = vadd.f32 %v104_v20, %v103_v19 }
 0x127   :  { %v106_v22 = vrot.slane %v105_v21, 1 }
 0x129   :  { %v107_v24 = vadd.f32 %v106_v22, %v105_v21 }
 0x12b   :  { %v108_v25 = vadd.f32 %v107_v24, %v100_v23 }
 0x12d   :  { %110 = vst.msk [vmem:[#allocation2] sm:$0x1] %vm69_vm1, %v108_v25 }
 0x134   :  { %v145_v26 = vld [vmem:[#allocation2] ss:$0 sm:$0xff] }
 0x135   :  { %124 = vperm.xlu1 %149, %v145_v26  }
 0x1b0   :  { %v125_v28 = vpop.permute.xlu1 %124 }
 0x1b1   :  { %v127_v29 = vsel %vm116_vm5, %v125_v28, 0.0 }
 0x1b2   :  { %128 = vst [vmem:[%s184_s2] sm:$0xff] %v127_v29 }

</bundles_post_ra>
